<compile_context>
chip_gen: v7x
topology: tpu7x:2x2x1
jax: 0.10.0
libtpu: 0.0.40
codegen_flags: <defaults>
</compile_context>

<pallas_src>
import functools
import math

import jax
import jax.numpy as jnp
from jax import lax
from jax.experimental import pallas as pl
from jax.experimental.pallas import tpu as pltpu

_VMEM_LIMIT = 48 * 1024 * 1024  # explicit scoped-VMEM limit; stays under v7x's 64 MiB


def _pick_tile(dim, cap, align):
    """Largest multiple of `align` that divides `dim` and is <= cap; full dim if small."""
    if dim <= cap:
        return dim
    t = (cap // align) * align
    while t >= align:
        if dim % t == 0:
            return t
        t -= align
    return dim  # fallback: no tiling along this dim


# ----------------------------------------------------------------------------
# Tiled, pipelined linear projection: y = x @ W + b
# ----------------------------------------------------------------------------
def _linear_kernel(x_ref, w_ref, b_ref, o_ref, acc_ref):
    kk = pl.program_id(2)

    @pl.when(kk == 0)
    def _():
        acc_ref[...] = jnp.zeros_like(acc_ref)

    acc_ref[...] += jnp.dot(x_ref[...], w_ref[...],
                            preferred_element_type=jnp.float32)

    @pl.when(kk == pl.num_programs(2) - 1)
    def _():
        o_ref[...] = (acc_ref[...] + b_ref[...].astype(jnp.float32)).astype(o_ref.dtype)


def linear(x2d, w, b, *, tm_cap=256, tn_cap=256, tk_cap=512):
    """x2d: (M, K), w: (K, N), b: (1, N) -> (M, N)."""
    M, K = x2d.shape
    N = w.shape[1]
    tm = _pick_tile(M, tm_cap, 8)
    tn = _pick_tile(N, tn_cap, 128)
    tk = _pick_tile(K, tk_cap, 128)
    grid = (M // tm, N // tn, K // tk)
    return pl.pallas_call(
        _linear_kernel,
        out_shape=jax.ShapeDtypeStruct((M, N), x2d.dtype),
        grid=grid,
        in_specs=[
            pl.BlockSpec((tm, tk), lambda i, j, kk: (i, kk)),
            pl.BlockSpec((tk, tn), lambda i, j, kk: (kk, j)),
            pl.BlockSpec((1, tn), lambda i, j, kk: (0, j)),
        ],
        out_specs=pl.BlockSpec((tm, tn), lambda i, j, kk: (i, j)),
        scratch_shapes=[pltpu.VMEM((tm, tn), jnp.float32)],
        compiler_params=pltpu.CompilerParams(
            dimension_semantics=("parallel", "parallel", "arbitrary"),
            vmem_limit_bytes=_VMEM_LIMIT,
        ),
    )(x2d, w, b)


# ----------------------------------------------------------------------------
# Attention kernel: one grid step = one batch row, all heads handled in-kernel
# ----------------------------------------------------------------------------
def _mha_kernel(q_ref, k_ref, v_ref, mask_ref, o_ref, *, h, d_k):
    inv_sqrt_dk = jnp.float32(1.0 / math.sqrt(d_k))
    q = q_ref[0].astype(jnp.float32) * inv_sqrt_dk   # pre-scale q, not the SxS scores
    k = k_ref[0].astype(jnp.float32)                 # (S, d_model)
    v = v_ref[0]                                     # (S, d_model)
    m = mask_ref[0, 0]                               # (S, S), broadcast over heads

    ctxs = []
    for i in range(h):                               # static unroll over heads
        lo = i * d_k
        qh = q[:, lo:lo + d_k]
        kh = k[:, lo:lo + d_k]
        vh = v[:, lo:lo + d_k]
        # q @ k^T without materializing a transposed K tile (contract last dims).
        scores = lax.dot_general(qh, kh, (((1,), (1,)), ((), ())),
                                 preferred_element_type=jnp.float32)   # (S, S)
        scores = jnp.where(m == 0, jnp.float32(-1e9), scores)
        scores = scores - jnp.max(scores, axis=-1, keepdims=True)
        p = jnp.exp(scores)
        p = p * pl.reciprocal(jnp.sum(p, axis=-1, keepdims=True), approx=True)
        # (dropout on `p` is identity in inference mode)
        ctxs.append(jnp.dot(p.astype(vh.dtype), vh,
                            preferred_element_type=jnp.float32))       # (S, d_k)

    # Single lane-dense (S, d_model) store — heads already in the right column order.
    o_ref[0] = jnp.concatenate(ctxs, axis=-1).astype(o_ref.dtype)


def multi_head_attention(q, k, v, mask, params, h):
    """q/k/v: (B, S, d_model), mask: (B, 1, S, S) int (or None). Returns (B, S, d_model)."""
    B, S, d_model = q.shape
    d_k = d_model // h
    if mask is None:
        mask = jnp.ones((B, 1, S, S), jnp.int32)

    # --- projections ---------------------------------------------------------
    if (q is k) and (k is v):
        # Self-attention: fused QKV projection (one matmul, x read from HBM once).
        w_qkv = jnp.concatenate([params["w_q"], params["w_k"], params["w_v"]], axis=1)
        b_qkv = jnp.concatenate([params["b_q"], params["b_k"], params["b_v"]], axis=1)
        qkv = linear(q.reshape(B * S, d_model), w_qkv, b_qkv)          # (B*S, 3*d_model)
        q_p = qkv[:, :d_model]
        k_p = qkv[:, d_model:2 * d_model]
        v_p = qkv[:, 2 * d_model:]
    else:
        q_p = linear(q.reshape(B * S, d_model), params["w_q"], params["b_q"])
        k_p = linear(k.reshape(B * S, d_model), params["w_k"], params["b_k"])
        v_p = linear(v.reshape(B * S, d_model), params["w_v"], params["b_v"])

    q_p = q_p.reshape(B, S, d_model)
    k_p = k_p.reshape(B, S, d_model)
    v_p = v_p.reshape(B, S, d_model)

    # --- attention: head split done in-kernel (no HBM transposes) -----------
    attn = pl.pallas_call(
        functools.partial(_mha_kernel, h=h, d_k=d_k),
        out_shape=jax.ShapeDtypeStruct((B, S, d_model), q.dtype),
        grid=(B,),
        in_specs=[
            pl.BlockSpec((1, S, d_model), lambda b: (b, 0, 0)),
            pl.BlockSpec((1, S, d_model), lambda b: (b, 0, 0)),
            pl.BlockSpec((1, S, d_model), lambda b: (b, 0, 0)),
            pl.BlockSpec((1, 1, S, S), lambda b: (b, 0, 0, 0)),  # mask, broadcast over heads
        ],
        out_specs=pl.BlockSpec((1, S, d_model), lambda b: (b, 0, 0)),
        compiler_params=pltpu.CompilerParams(
            dimension_semantics=("parallel",),
            vmem_limit_bytes=_VMEM_LIMIT,
        ),
    )(q_p, k_p, v_p, mask)

    # --- output projection ----------------------------------------------------
    out = linear(attn.reshape(B * S, d_model), params["w_o"], params["b_o"])
    return out.reshape(B, S, d_model)


# ----------------------------------------------------------------------------
# Pure-JAX reference for correctness
# ----------------------------------------------------------------------------
def reference(q, k, v, mask, params, h):
    B, S, d_model = q.shape
    d_k = d_model // h

    def lin(x, w, b):
        return x @ w + b

    def split(x):
        return x.reshape(B, S, h, d_k).transpose(0, 2, 1, 3)

    qh = split(lin(q, params["w_q"], params["b_q"]))
    kh = split(lin(k, params["w_k"], params["b_k"]))
    vh = split(lin(v, params["w_v"], params["b_v"]))

    scores = jnp.einsum("bhqd,bhkd->bhqk", qh, kh) / math.sqrt(d_k)
    scores = jnp.where(mask == 0, -1e9, scores)
    p = jax.nn.softmax(scores, axis=-1)
    x = jnp.einsum("bhqk,bhkd->bhqd", p, vh)
    x = x.transpose(0, 2, 1, 3).reshape(B, S, d_model)
    return lin(x, params["w_o"], params["b_o"])


if __name__ == "__main__":
    B, S, d_model, h = 2, 8, 32, 4

    key = jax.random.PRNGKey(0)
    keys = jax.random.split(key, 10)

    def winit(kk):
        return (jax.random.normal(kk, (d_model, d_model), jnp.float32)
                / math.sqrt(d_model))

    params = {
        "w_q": winit(keys[0]), "b_q": jax.random.normal(keys[1], (1, d_model)) * 0.1,
        "w_k": winit(keys[2]), "b_k": jax.random.normal(keys[3], (1, d_model)) * 0.1,
        "w_v": winit(keys[4]), "b_v": jax.random.normal(keys[5], (1, d_model)) * 0.1,
        "w_o": winit(keys[6]), "b_o": jax.random.normal(keys[7], (1, d_model)) * 0.1,
    }

    # Self-attention input (exercises the fused-QKV path) + causal mask.
    x = jax.random.normal(keys[8], (B, S, d_model), jnp.float32)
    mask = jnp.tril(jnp.ones((S, S), jnp.int32))[None, None].repeat(B, axis=0)

    out = multi_head_attention(x, x, x, mask, params, h)
    out = jax.block_until_ready(out)

    ref = reference(x, x, x, mask, params, h)
    assert out.shape == (B, S, d_model)
    # tolerance loosened slightly for pl.reciprocal(approx=True) in the softmax
    assert jnp.allclose(out, ref, atol=1e-2, rtol=1e-2), "mismatch vs reference"

    print("KERNEL_OK")
</pallas_src>

<mosaic_0001>
module attributes {stable_mosaic.version = 11 : i64} {
  func.func @_linear_kernel(%arg0: i32, %arg1: i32, %arg2: i32, %arg3: memref<16x32xf32, #tpu.memory_space<vmem>>, %arg4: memref<32x96xf32, #tpu.memory_space<vmem>>, %arg5: memref<1x96xf32, #tpu.memory_space<vmem>>, %arg6: memref<16x96xf32, #tpu.memory_space<vmem>>, %arg7: memref<16x96xf32, #tpu.memory_space<vmem>>) attributes {dimension_semantics = [#tpu.dimension_semantics<parallel>, #tpu.dimension_semantics<parallel>, #tpu.dimension_semantics<arbitrary>], iteration_bounds = array<i64: 1, 1, 1>, scalar_prefetch = 0 : i64, scratch_operands = 1 : i64, tpu.core_type = #tpu.core_type<tc>, window_params = [{transform_indices = @transform_0, window_bounds = array<i64: 16, 32>}, {transform_indices = @transform_1, window_bounds = array<i64: 32, 96>}, {transform_indices = @transform_2, window_bounds = array<i64: 1, 96>}, {transform_indices = @transform_3, window_bounds = array<i64: 16, 96>}]} {
    %c0_i32 = arith.constant 0 : i32
    %0 = arith.cmpi eq, %arg2, %c0_i32 : i32
    %1 = arith.extui %0 : i1 to i32
    %c0_i32_0 = arith.constant 0 : i32
    %2 = arith.cmpi ne, %1, %c0_i32_0 : i32
    scf.if %2 {
      %cst_10 = arith.constant 0.000000e+00 : f32
      %12 = vector.broadcast %cst_10 : f32 to vector<16x96xf32>
      %c0_11 = arith.constant 0 : index
      %c0_12 = arith.constant 0 : index
      %13 = vector.load %arg7[%c0_11, %c0_12] : memref<16x96xf32, #tpu.memory_space<vmem>>, vector<16x96xf32>
      tpu.vector_store %arg7[%c0_11, %c0_12], %12 {strides = array<i32>} : memref<16x96xf32, #tpu.memory_space<vmem>>, vector<16x96xf32>,
    } else {
    }
    %c0 = arith.constant 0 : index
    %c0_1 = arith.constant 0 : index
    %3 = vector.load %arg7[%c0, %c0_1] : memref<16x96xf32, #tpu.memory_space<vmem>>, vector<16x96xf32>
    %c0_2 = arith.constant 0 : index
    %c0_3 = arith.constant 0 : index
    %4 = vector.load %arg3[%c0_2, %c0_3] : memref<16x32xf32, #tpu.memory_space<vmem>>, vector<16x32xf32>
    %c0_4 = arith.constant 0 : index
    %c0_5 = arith.constant 0 : index
    %5 = vector.load %arg4[%c0_4, %c0_5] : memref<32x96xf32, #tpu.memory_space<vmem>>, vector<32x96xf32>
    %cst = arith.constant dense<0.000000e+00> : vector<16x96xf32>
    %6 = tpu.matmul %4, %5, %cst {dimension_numbers = #tpu.dot_dimension_numbers<[1], [0], [0], [1], [0, 0, 1, 1], [], []>} : vector<16x32xf32>, vector<32x96xf32>, vector<16x96xf32> -> vector<16x96xf32>
    %7 = arith.addf %3, %6 : vector<16x96xf32>
    %c0_6 = arith.constant 0 : index
    %c0_7 = arith.constant 0 : index
    %8 = vector.load %arg7[%c0_6, %c0_7] : memref<16x96xf32, #tpu.memory_space<vmem>>, vector<16x96xf32>
    tpu.vector_store %arg7[%c0_6, %c0_7], %7 {strides = array<i32>} : memref<16x96xf32, #tpu.memory_space<vmem>>, vector<16x96xf32>,
    %c0_i32_8 = arith.constant 0 : i32
    %9 = arith.cmpi eq, %arg2, %c0_i32_8 : i32
    %10 = arith.extui %9 : i1 to i32
    %c0_i32_9 = arith.constant 0 : i32
    %11 = arith.cmpi ne, %10, %c0_i32_9 : i32
    scf.if %11 {
      %c0_10 = arith.constant 0 : index
      %c0_11 = arith.constant 0 : index
      %12 = vector.load %arg7[%c0_10, %c0_11] : memref<16x96xf32, #tpu.memory_space<vmem>>, vector<16x96xf32>
      %c0_12 = arith.constant 0 : index
      %c0_13 = arith.constant 0 : index
      %13 = vector.load %arg5[%c0_12, %c0_13] : memref<1x96xf32, #tpu.memory_space<vmem>>, vector<1x96xf32>
      %14 = vector.broadcast %13 : vector<1x96xf32> to vector<16x96xf32>
      %15 = arith.addf %12, %14 : vector<16x96xf32>
      %c0_14 = arith.constant 0 : index
      %c0_15 = arith.constant 0 : index
      %16 = vector.load %arg6[%c0_14, %c0_15] : memref<16x96xf32, #tpu.memory_space<vmem>>, vector<16x96xf32>
      tpu.vector_store %arg6[%c0_14, %c0_15], %15 {strides = array<i32>} : memref<16x96xf32, #tpu.memory_space<vmem>>, vector<16x96xf32>,
    } else {
    }
    return
  }
  func.func @transform_0(%arg0: i32, %arg1: i32, %arg2: i32) -> (i32, i32) {
    %c0_i32 = arith.constant 0 : i32
    return %arg0, %arg2 : i32, i32
  }
  func.func @transform_1(%arg0: i32, %arg1: i32, %arg2: i32) -> (i32, i32) {
    %c0_i32 = arith.constant 0 : i32
    return %arg2, %arg1 : i32, i32
  }
  func.func @transform_2(%arg0: i32, %arg1: i32, %arg2: i32) -> (i32, i32) {
    %c0_i32 = arith.constant 0 : i32
    %c0_i32_0 = arith.constant 0 : i32
    return %c0_i32, %arg1 : i32, i32
  }
  func.func @transform_3(%arg0: i32, %arg1: i32, %arg2: i32) -> (i32, i32) {
    %c0_i32 = arith.constant 0 : i32
    return %arg0, %arg1 : i32, i32
  }
}

</mosaic_0001>

<bundles_post_ra>
// kernel: tpu_custom_call.1
= control target key start
LH: loop header
LB: loop body
LE: loop exit
PB: predicated region body
PF: predicated region fallthrough
CT: control target
= control target key end

     0   :  { %8 = vsyncpa [#allocation4], 0  ;;  %s365_s0 = inlined_call_operand.hbm [shape: f32[16,32], index: 0, kind: input, shape index: {}]   ;;  %s366_s1 = inlined_call_operand.hbm [shape: f32[32,96], index: 1, kind: input, shape index: {}]   ;;  %s367_s2 = inlined_call_operand.vmem [shape: f32[1,96], index: 2, kind: input, shape index: {}]   ;;  %s368_s3 = inlined_call_operand.hbm [shape: f32[16,96], index: 3, kind: output, shape index: {}]  }
   0x1   :  { %9 = vsyncpa [#allocation7], 0 }
   0x2   :  { %10 = vsyncpa [#allocation5], 0  ;;  %s285_s12 = smov [#allocation3]   ;;  %s213_s16 = scalar_lea.hbm %s365_s0, 256 }
   0x3   :  { %s16_s13 = sshll.u32 %s285_s12, 4  ;;  %p214_p0 = scmp.ne.s32.totalorder %s365_s0, %s213_s16  ;;  %s17_s13 = int_to_ptr.vmem [resolvable:$true] %s16_s13 }
   0x4   :  { %p217_p1 = scmp.lt.u32.totalorder %s213_s16, %s365_s0 }
   0x6   :  { %p219_p2 = pnand %p217_p1, %p214_p0 }
   0x8   :  { %222 = shalt.err (!%p219_p2)
}
   0x9   :  { %s223_s21 = scalar_lea.vmem %s17_s13, 256  ;;  %p228_p4 = scmp.lt.s32.totalorder %s17_s13, %s17_s13 }
   0xa   :  { %p224_p3 = scmp.ne.s32.totalorder %s17_s13, %s223_s21  ;;  %p229_p5 = scmp.lt.s32.totalorder %s223_s21, %s223_s21 }
   0xc   :  { %p230_p6 = por %p229_p5, %p228_p4 }
   0xe   :  { %p231_p7 = pnand %p230_p6, %p224_p3 }
  0x10   :  { %234 = shalt.err (!%p231_p7)
}
  0x11   :  { %s286_s22 = smov 128   ;;  %s287_s23 = smov 8  }
  0x12   :  { %22 = dma.hbm_to_vmem [thread:$0]  %s365_s0, 256, %s17_s13, [#allocation4], %s286_s22, %s286_s22, %s287_s23  }
  0x13   :  { %s288_s26 = smov [#allocation6]   ;;  %s235_s30 = scalar_lea.hbm %s366_s1, 512 }
  0x14   :  { %s28_s27 = sshll.u32 %s288_s26, 4  ;;  %p236_p8 = scmp.ne.s32.totalorder %s366_s1, %s235_s30  ;;  %s29_s27 = int_to_ptr.vmem [resolvable:$true] %s28_s27 }
  0x15   :  { %p239_p9 = scmp.lt.u32.totalorder %s235_s30, %s366_s1 }
  0x17   :  { %p241_p10 = pnand %p239_p9, %p236_p8 }
  0x19   :  { %244 = shalt.err (!%p241_p10)
}
  0x1a   :  { %s245_s8 = scalar_lea.vmem %s29_s27, 512  ;;  %p250_p12 = scmp.lt.s32.totalorder %s29_s27, %s29_s27 }
  0x1b   :  { %p246_p11 = scmp.ne.s32.totalorder %s29_s27, %s245_s8  ;;  %p251_p13 = scmp.lt.s32.totalorder %s245_s8, %s245_s8 }
  0x1d   :  { %p252_p0 = por %p251_p13, %p250_p12 }
  0x1f   :  { %p253_p1 = pnand %p252_p0, %p246_p11 }
  0x21   :  { %256 = shalt.err (!%p253_p1)
}
  0x22   :  { %34 = dma.hbm_to_vmem [thread:$0]  %s366_s1, 512, %s29_s27, [#allocation7], %s286_s22, %s286_s22, %s287_s23  }
  0x23   :  { %279 = dma.done.wait [#allocation4], 256  }
  0x24   :  { %280 = vsyncadd [#allocation4], 4294967040 }
  0x25   :  { %281 = dma.done.wait [#allocation7], 512  }
  0x26   :  { %282 = vsyncadd [#allocation7], 4294966784  ;;  %vm47_vm0 = vcmask 785408   ;;  %v289_v0 = vmov 0.0   ;;  %vm58_vm1 = vcmask 261120   ;;  %v54_v1 = vld [vmem:[#allocation6] sm:$0xff] }
  0x27   :  { %49 = vst.msk [vmem:[#allocation2 + $0x8] sm:$0xff] %vm47_vm0, %v289_v0  ;;  %48 = vst.msk [vmem:[#allocation2] sm:$0xff] %vm47_vm0, %v289_v0  ;;  %v55_v2 = vld [vmem:[#allocation6 + $0x8] sm:$0xff]  ;;  %v56_v3 = vld [vmem:[#allocation6 + $0x10] sm:$0xff]  ;;  %s290_s11 = smov [#allocation8]  }
  0x28   :  { %v199_v4 = vpack.c.bf16 %v55_v2, %v54_v1  ;;  %v57_v5 = vld [vmem:[#allocation6 + $0x18] sm:$0xff]  ;;  %v52_v6 = vld [vmem:[#allocation3] sm:$0xff]  ;;  %v181_v15 = vld [vmem:[%s367_s2] ss:$0 sm:$0xff]  ;;  %s166_s12 = sshll.u32 %s290_s11, 4  ;;  %s167_s12 = int_to_ptr.vmem [resolvable:$true] %s166_s12 }
  0x29   :  { %v203_v7 = vpack.c.bf16 %v57_v5, %v56_v3  ;;  %196 = vmatprep.mubr.msk.f32.mxu0 %vm58_vm1, %v52_v6  ;;  %v53_v8 = vld [vmem:[#allocation3 + $0x8] sm:$0xff]  ;;  %s257_s13 = scalar_lea.vmem %s167_s12, 256  ;;  %p262_p3 = scmp.lt.s32.totalorder %s167_s12, %s167_s12 }
  0x2a   :  { %200 = vmatprep.subr.bf16.mxu0 %v199_v4  ;;  %p258_p2 = scmp.ne.s32.totalorder %s167_s12, %s257_s13  ;;  %p263_p4 = scmp.lt.s32.totalorder %s257_s13, %s257_s13 }
  0x2b   :  { %202 = vmatpush3.bf16.msra.mxu0 %v199_v4 }
  0x2c   :  { %204 = vmatprep.subr.bf16.mxu0 %v203_v7  ;;  %p264_p5 = por %p263_p4, %p262_p3 }
  0x2e   :  { %v51_v9 = vld [vmem:[#allocation2 + $0x8] sm:$0xff]  ;;  %v50_v10 = vld [vmem:[#allocation2] sm:$0xff]  ;;  %p265_p6 = pnand %p264_p5, %p258_p2 }
  0x2f   :  { %206 = vmatpush3.bf16.msra.mxu0 %v203_v7 }
  0x32   :  { %197 = vmatmul.mubr.msk.f32.vlgmr.msra.gmra.mrb[0].mxu0 %vm58_vm1, %v53_v8 }
 0x105   :  { %v198_v11 = vpop.f32.mrb[0].mxu0 }
 0x106   :  { %v141_v12 = vadd.f32 %v198_v11, %v51_v9  ;;  %v131_v13 = vpop.f32.mrb[1].mxu0 }
 0x107   :  { %v140_v14 = vadd.f32 %v131_v13, %v50_v10 }
 0x108   :  { %144 = vst.msk [vmem:[#allocation2 + $0x8] sm:$0xff] %vm47_vm0, %v141_v12 }
 0x109   :  { %143 = vst.msk [vmem:[#allocation2] sm:$0xff] %vm47_vm0, %v140_v14 }
 0x10f   :  { %v149_v16 = vld [vmem:[#allocation2 + $0x8] sm:$0xff] }
 0x110   :  { %v148_v17 = vld [vmem:[#allocation2] sm:$0xff]  ;;  %v158_v18 = vadd.f32 %v181_v15, %v149_v16 }
 0x111   :  { %v157_v19 = vadd.f32 %v181_v15, %v148_v17 }
 0x112   :  { %160 = vst.msk [vmem:[#allocation8 + $0x8] sm:$0xff] %vm47_vm0, %v158_v18 }
 0x113   :  { %159 = vst.msk [vmem:[#allocation8] sm:$0xff] %vm47_vm0, %v157_v19 }
 0x114   :  { %268 = shalt.err (!%p265_p6)
}
 0x115   :  { %s269_s15 = scalar_lea.hbm %s368_s3, 256 }
 0x116   :  { %p270_p7 = scmp.ne.s32.totalorder %s368_s3, %s269_s15  ;;  %p273_p8 = scmp.lt.u32.totalorder %s269_s15, %s368_s3 }
 0x118   :  { %p275_p9 = pnand %p273_p8, %p270_p7 }
 0x11a   :  { %278 = shalt.err (!%p275_p9)
}
 0x11b   :  { %172 = dma.vmem_to_hbm [thread:$0]  %s167_s12, 256, %s368_s3, [#allocation5], %s286_s22, %s286_s22, %s287_s23  }
 0x11c   :  { %283 = dma.done.wait [#allocation5], 256  }
 0x11d   :  { %284 = vsyncadd [#allocation5], 4294967040 }
 0x11e   :  { %176 = vsyncpa [#allocation4], 1 }
 0x11f   :  { %177 = vsyncpa [#allocation7], 1 }
 0x120   :  { %178 = vsyncpa [#allocation5], 1 }

</bundles_post_ra>
